<compile_context>
chip_gen: v5e
topology: v5e:2x2
jax: 0.10.0
libtpu: 0.0.40
codegen_flags: <defaults>
</compile_context>

<pallas_src>
import functools

import jax
import jax.numpy as jnp
from jax.experimental import pallas as pl
from jax.experimental.pallas import tpu as pltpu


def _v1_kernel(p_ref, w_ref, b_ref, out_ref, *, bn):
    """p_ref  : (bn, Kp, H*W)   im2col patches (H*W on the 128-lane axis)
       w_ref  : (Cout, Kp)      conv weights with BN scale folded in
       b_ref  : (Cout, 1)       folded BN bias
       out_ref: (bn, Cout, H*W) output (NCHW once reshaped in the wrapper)
    """
    w = w_ref[...]
    bias = b_ref[...]
    for b in range(bn):  # small static unroll (bn <= 8)
        acc = jnp.dot(w, p_ref[b], preferred_element_type=jnp.float32)  # (Cout, H*W)
        out_ref[b] = jnp.maximum(acc + bias, 0.0).astype(out_ref.dtype)


def _pick_batch_block(n):
    if n <= 1:
        return 1
    # aim for ~8 images per grid step, but keep >= 2 grid steps (v7x: 2 TensorCores)
    return max(1, min(8, n // 2))


def v1_filter_forward(x_nchw, weight, gamma, beta, running_mean, running_var, eps=1e-5):
    """x_nchw: (N, 3, H, W) f32; weight: (64, 3, 3, 3) OIHW (PyTorch). Returns (N, 64, H, W)."""
    N, Cin, H, W = x_nchw.shape
    Cout, _, KH, KW = weight.shape
    pad = KH // 2
    K = Cin * KH * KW
    Kp = ((K + 7) // 8) * 8          # 27 -> 32 sublanes
    HW = H * W

    # ---- wrapper-side im2col: lane-dense (N, Kp, H*W); k ordered (c, kh, kw) to match OIHW ----
    x_pad = jnp.pad(x_nchw, ((0, 0), (0, 0), (pad, pad), (pad, pad)))
    patch_rows = [x_pad[:, c, kh:kh + H, kw:kw + W]
                  for c in range(Cin) for kh in range(KH) for kw in range(KW)]
    patches = jnp.stack(patch_rows, axis=1).reshape(N, K, HW).astype(jnp.float32)
    patches = jnp.pad(patches, ((0, 0), (0, Kp - K), (0, 0)))

    # ---- fold eval-mode BatchNorm into the conv weights and a per-channel bias ----
    inv = gamma / jnp.sqrt(running_var + eps)                            # (Cout,)
    w2 = (weight.reshape(Cout, K) * inv[:, None]).astype(jnp.float32)    # scale folded in
    w2 = jnp.pad(w2, ((0, 0), (0, Kp - K)))                              # (Cout, Kp)
    bias = (beta - running_mean * inv).reshape(Cout, 1).astype(jnp.float32)

    # ---- batch blocking ----
    bn = _pick_batch_block(N)
    n_blocks = pl.cdiv(N, bn)
    Np = n_blocks * bn
    if Np != N:
        patches = jnp.pad(patches, ((0, Np - N), (0, 0), (0, 0)))

    kernel = functools.partial(_v1_kernel, bn=bn)
    # NOTE: operands kept in f32; a bf16 cast (v6e/v7x) would help on large shapes but
    # is skipped here to preserve the 1e-4 accuracy check.

    out = pl.pallas_call(
        kernel,
        out_shape=jax.ShapeDtypeStruct((Np, Cout, HW), jnp.float32),
        grid_spec=pltpu.PrefetchScalarGridSpec(
            num_scalar_prefetch=0,
            grid=(n_blocks,),
            in_specs=[
                pl.BlockSpec((bn, Kp, HW), lambda i: (i, 0, 0)),
                pl.BlockSpec((Cout, Kp), lambda i: (0, 0)),
                pl.BlockSpec((Cout, 1), lambda i: (0, 0)),
            ],
            out_specs=pl.BlockSpec((bn, Cout, HW), lambda i: (i, 0, 0)),
        ),
        compiler_params=pltpu.CompilerParams(dimension_semantics=("parallel",)),
    )(patches, w2, bias)

    # Output is already channel-major: (N, Cout, H*W) -> (N, Cout, H, W); no transpose needed.
    return out[:N].reshape(N, Cout, H, W)


def _reference(x_nchw, weight, gamma, beta, running_mean, running_var, eps=1e-5):
    KH = weight.shape[2]
    pad = KH // 2
    y = jax.lax.conv_general_dilated(
        x_nchw, weight, window_strides=(1, 1), padding=((pad, pad), (pad, pad)),
        dimension_numbers=("NCHW", "OIHW", "NCHW"))
    inv = gamma / jnp.sqrt(running_var + eps)
    y = y * inv[None, :, None, None] + (beta - running_mean * inv)[None, :, None, None]
    return jnp.maximum(y, 0.0)


if __name__ == "__main__":
    key = jax.random.PRNGKey(0)
    k_x, k_w, k_g, k_b, k_m, k_v = jax.random.split(key, 6)

    N, Cin, H, W = 2, 3, 16, 16
    Cout, KH, KW = 64, 3, 3

    x = jax.random.normal(k_x, (N, Cin, H, W), dtype=jnp.float32)
    weight = jax.random.normal(k_w, (Cout, Cin, KH, KW), dtype=jnp.float32) * 0.1
    gamma = jax.random.normal(k_g, (Cout,), dtype=jnp.float32) * 0.1 + 1.0
    beta = jax.random.normal(k_b, (Cout,), dtype=jnp.float32) * 0.1
    running_mean = jax.random.normal(k_m, (Cout,), dtype=jnp.float32) * 0.1
    running_var = jnp.abs(jax.random.normal(k_v, (Cout,), dtype=jnp.float32)) * 0.1 + 1.0

    out = v1_filter_forward(x, weight, gamma, beta, running_mean, running_var)
    out = jax.block_until_ready(out)

    ref = _reference(x, weight, gamma, beta, running_mean, running_var)
    assert out.shape == (N, Cout, H, W), out.shape
    assert jnp.allclose(out, ref, rtol=1e-4, atol=1e-4), float(jnp.max(jnp.abs(out - ref)))

    print("KERNEL_OK")
</pallas_src>

<mosaic_0001>
module attributes {stable_mosaic.version = 11 : i64} {
  func.func @_v1_kernel(%arg0: i32, %arg1: memref<1x32x256xf32, #tpu.memory_space<vmem>>, %arg2: memref<64x32xf32, #tpu.memory_space<vmem>>, %arg3: memref<64x1xf32, #tpu.memory_space<vmem>>, %arg4: memref<1x64x256xf32, #tpu.memory_space<vmem>>) attributes {dimension_semantics = [#tpu.dimension_semantics<parallel>], iteration_bounds = array<i64: 2>, scalar_prefetch = 0 : i64, scratch_operands = 0 : i64, tpu.core_type = #tpu.core_type<tc>, window_params = [{transform_indices = @transform_0, window_bounds = array<i64: 1, 32, 256>}, {pipeline_mode = #tpu.pipeline_mode<synchronous>, transform_indices = @transform_1, window_bounds = array<i64: 64, 32>}, {pipeline_mode = #tpu.pipeline_mode<synchronous>, transform_indices = @transform_2, window_bounds = array<i64: 64, 1>}, {transform_indices = @transform_3, window_bounds = array<i64: 1, 64, 256>}]} {
    %c0 = arith.constant 0 : index
    %c0_0 = arith.constant 0 : index
    %0 = vector.load %arg2[%c0, %c0_0] : memref<64x32xf32, #tpu.memory_space<vmem>>, vector<64x32xf32>
    %c0_1 = arith.constant 0 : index
    %c0_2 = arith.constant 0 : index
    %1 = vector.load %arg3[%c0_1, %c0_2] : memref<64x1xf32, #tpu.memory_space<vmem>>, vector<64x1xf32>
    %c0_3 = arith.constant 0 : index
    %c0_4 = arith.constant 0 : index
    %c0_5 = arith.constant 0 : index
    %2 = vector.load %arg1[%c0_3, %c0_4, %c0_5] : memref<1x32x256xf32, #tpu.memory_space<vmem>>, vector<1x32x256xf32>
    %3 = vector.shape_cast %2 : vector<1x32x256xf32> to vector<32x256xf32>
    %cst = arith.constant dense<0.000000e+00> : vector<64x256xf32>
    %4 = tpu.matmul %0, %3, %cst {dimension_numbers = #tpu.dot_dimension_numbers<[1], [0], [0], [1], [0, 0, 1, 1], [], []>} : vector<64x32xf32>, vector<32x256xf32>, vector<64x256xf32> -> vector<64x256xf32>
    %5 = vector.broadcast %1 : vector<64x1xf32> to vector<64x256xf32>
    %6 = arith.addf %4, %5 : vector<64x256xf32>
    %cst_6 = arith.constant 0.000000e+00 : f32
    %7 = vector.broadcast %cst_6 : f32 to vector<64x256xf32>
    %8 = arith.maximumf %6, %7 : vector<64x256xf32>
    %c0_7 = arith.constant 0 : index
    %c0_8 = arith.constant 0 : index
    %c0_9 = arith.constant 0 : index
    %9 = vector.load %arg4[%c0_7, %c0_8, %c0_9] : memref<1x64x256xf32, #tpu.memory_space<vmem>>, vector<1x64x256xf32>
    %10 = vector.shape_cast %9 : vector<1x64x256xf32> to vector<64x256xf32>
    %11 = vector.shape_cast %8 : vector<64x256xf32> to vector<1x64x256xf32>
    tpu.vector_store %arg4[%c0_7, %c0_8, %c0_9], %11 {strides = array<i32>} : memref<1x64x256xf32, #tpu.memory_space<vmem>>, vector<1x64x256xf32>,
    return
  }
  func.func @transform_0(%arg0: i32) -> (i32, i32, i32) {
    %c0_i32 = arith.constant 0 : i32
    %c0_i32_0 = arith.constant 0 : i32
    %c0_i32_1 = arith.constant 0 : i32
    return %arg0, %c0_i32, %c0_i32_0 : i32, i32, i32
  }
  func.func @transform_1(%arg0: i32) -> (i32, i32) {
    %c0_i32 = arith.constant 0 : i32
    %c0_i32_0 = arith.constant 0 : i32
    %c0_i32_1 = arith.constant 0 : i32
    return %c0_i32, %c0_i32_0 : i32, i32
  }
  func.func @transform_2(%arg0: i32) -> (i32, i32) {
    %c0_i32 = arith.constant 0 : i32
    %c0_i32_0 = arith.constant 0 : i32
    %c0_i32_1 = arith.constant 0 : i32
    return %c0_i32, %c0_i32_0 : i32, i32
  }
  func.func @transform_3(%arg0: i32) -> (i32, i32, i32) {
    %c0_i32 = arith.constant 0 : i32
    %c0_i32_0 = arith.constant 0 : i32
    %c0_i32_1 = arith.constant 0 : i32
    return %arg0, %c0_i32, %c0_i32_0 : i32, i32, i32
  }
}

</mosaic_0001>

<bundles_post_ra>
// kernel: tpu_custom_call.1
= control target key start
LH: loop header
LB: loop body
LE: loop exit
PB: predicated region body
PF: predicated region fallthrough
CT: control target
= control target key end

     0   :  { %8 = vsyncpa [#allocation3], 0  ;;  %s792_s0 = inlined_call_operand.vmem [shape: f32[2,32,256], index: 0, kind: input, shape index: {}]   ;;  %s793_s1 = inlined_call_operand.vmem [shape: f32[64,32], index: 1, kind: input, shape index: {}]   ;;  %s794_s2 = inlined_call_operand.vmem [shape: f32[64,1], index: 2, kind: input, shape index: {}]   ;;  %s795_s3 = inlined_call_operand.hbm [shape: f32[2,64,256], index: 3, kind: output, shape index: {}]  }
   0x1   :  { %10 = vsyncpa [#allocation3 + $0x1], 0  ;;  %s620_s12 = smov 0   ;;  %s622_s13 = smov 0  }
   0x2   :  { %s624_s14 = smov 0   ;;  %s626_s15 = smov 0  }
   0x3 LB: > { %s641_s16 = sadd.s32 4294967295, %s595_s15   ;;  %s450_s17 = sadd.s32 4294967294, %s595_s15   ;;  %s595_s15 = sphi %s626_s15, %s801_s15   ;;  %s591_s14 = sphi %s624_s14, %s800_s14   ;;  %s587_s13 = sphi %s622_s13, %s799_s13   ;;  %s583_s12 = sphi %s620_s12, %s798_s12  }
   0x4   : > { %s645_s18 = sadd.s32 1, %s595_s15   ;;  %s91_s19 = sadd.s32 1, %s591_s14 }
   0x5   : > { %s88_s20 = ssub.s32 %s595_s15, %s645_s18  ;;  %p101_p0 = scmp.ne.s32.totalorder %s591_s14, %s587_s13 }
   0x6   : > { %p89_p1 = scmp.eq.s32.totalorder %s88_s20, 0  ;;  %p102_p2 = scmp.eq.s32.totalorder %s641_s16, 1 }
   0x7   : > { %p107_p3 = scmp.ne.s32.totalorder %s587_s13, %s583_s12  ;;  %p108_p4 = scmp.eq.s32.totalorder %s450_s17, 1 }
   0x8   : > { %s656_s21 = scalar_select %p89_p1, %s591_s14, %s91_s19  }
   0x9   : > { %p658_p5 = por %p102_p2, %p101_p0  ;;  %p662_p6 = por %p108_p4, %p107_p3 }
   0xa   : > { %p453_p7 = scmp.ge.s32.totalorder %s595_s15, 1  ;;  %p140_p8 = scmp.lt.s32.totalorder %s595_s15, 3 }
   0xc   : > { %p141_p9 = pnand %p453_p7, %p140_p8 }
   0xd   : > { %p164_p10 = scmp.lt.s32.totalorder (!%p141_p9), %s641_s16, 1  ;;  %s161_s25 = sand.u32 (!%p141_p9), 1, %s587_s13  }
   0xe   : > { %144 = sbr.rel (%p141_p9) target bundleno = 197 (0xc5), region = 32  ;;  %s454_s26 = sshll.u32 (!%p141_p9), %s161_s25, 7 }
   0xf   : > { %s740_s27 = scalar_lea.vmem (!%p141_p9), [#allocation2], %s454_s26  ;;  %s373_s6 = scalar_lea.sflag (!%p141_p9), [#allocation3], %s161_s25 }
  0x10   : > { %s553_s11 = scalar_lea.hbm (!%p141_p9), %s795_s3, 256 }
  0x13   : > { %v597_v0 = vmov 0   ;;  %v179_v1 = vld [vmem:[%s794_s2 + $0x10] sm:$0xff]  ;;  %v177_v2 = vld [vmem:[%s794_s2] sm:$0xff]  ;;  %s165_s28 = scalar_select %p164_p10, %s641_s16, 1  ;;  %vm233_vm0 = vcmask 261120   ;;  %v180_v13 = vld [vmem:[%s794_s2 + $0x18] sm:$0xff] }
  0x14   : > { %531 = vset.pattern.permute.xlu1 %v597_v0  ;;  %530 = vset.pattern.permute.xlu0 %v597_v0  ;;  %v169_v11 = vld [vmem:[%s793_s1] sm:$0xff]  ;;  %v178_v14 = vld [vmem:[%s794_s2 + $0x8] sm:$0xff]  ;;  %v184_v18 = vld [vmem:[%s794_s2 + $0x38] sm:$0xff] }
  0x15   : > { %205 = vperm.xlu1 %531, %v179_v1   ;;  %195 = vperm.xlu0 %530, %v177_v2   ;;  %s478_s29 = sshll.u32 %s165_s28, 6  ;;  %v173_v12 = vld [vmem:[%s793_s1 + $0x20] sm:$0xff]  ;;  %v170_v16 = vld [vmem:[%s793_s1 + $0x8] sm:$0xff]  ;;  %v183_v19 = vld [vmem:[%s794_s2 + $0x30] sm:$0xff]  ;;  %s479_s28 = sshll.u32 %s641_s16, 7 }
  0x16   : > { %532 = vset.pattern.permute.xlu2 %v597_v0  ;;  %s168_s5 = scalar_lea.vmem %s792_s0, %s478_s29  ;;  %v181_v15 = vld [vmem:[%s794_s2 + $0x20] sm:$0xff]  ;;  %v174_v17 = vld [vmem:[%s793_s1 + $0x28] sm:$0xff]  ;;  %v171_v21 = vld [vmem:[%s793_s1 + $0x10] sm:$0xff]  ;;  %s384_s4 = scalar_lea.hbm %s795_s3, %s479_s28 }
  0x17   : > { %v191_v3 = vld [vmem:[%s168_s5 + $0x30] sm:$0xff]  ;;  %v192_v4 = vld [vmem:[%s168_s5 + $0x38] sm:$0xff]  ;;  %v189_v5 = vld [vmem:[%s168_s5 + $0x20] sm:$0xff]  ;;  %215 = vperm.xlu2 %532, %v181_v15   ;;  %s385_s16 = sshll.u32 %s740_s27, 4  ;;  %s386_s16 = int_to_ptr.vmem [resolvable:$true] %s385_s16 }
  0x18   : > { %270 = vmatpush.msra.mxu0 %v191_v3  ;;  %480 = vmatpush.msra.mxu2 %v191_v3  ;;  %v190_v6 = vld [vmem:[%s168_s5 + $0x28] sm:$0xff]  ;;  %v187_v7 = vld [vmem:[%s168_s5 + $0x10] sm:$0xff]  ;;  %v188_v8 = vld [vmem:[%s168_s5 + $0x18] sm:$0xff] }
  0x19   : > { %311 = vmatpush.msra.mxu1 %v192_v4  ;;  %484 = vmatpush.msra.mxu3 %v192_v4  ;;  %v185_v9 = vld [vmem:[%s168_s5] sm:$0xff]  ;;  %v186_v10 = vld [vmem:[%s168_s5 + $0x8] sm:$0xff]  ;;  %v175_v22 = vld [vmem:[%s793_s1 + $0x30] sm:$0xff]  ;;  %s387_s5 = sshll.u32 %s384_s4, 4  ;;  %s388_s5 = int_to_ptr.hbm [resolvable:$true] %s387_s5 }
  0x1a   : > { %271 = vmatpush.msra.mxu0 %v189_v5  ;;  %481 = vmatpush.msra.mxu2 %v189_v5  ;;  %v182_v20 = vld [vmem:[%s794_s2 + $0x28] sm:$0xff]  ;;  %v172_v23 = vld [vmem:[%s793_s1 + $0x18] sm:$0xff]  ;;  %s547_s7 = sshra.s32 %s388_s5, 4  ;;  %s548_s7 = int_to_ptr.hbm [resolvable:$true] %s547_s7 }
  0x1b   : > { %312 = vmatpush.msra.mxu1 %v190_v6  ;;  %485 = vmatpush.msra.mxu3 %v190_v6  ;;  %v176_v24 = vld [vmem:[%s793_s1 + $0x38] sm:$0xff]  ;;  %s549_s8 = scalar_lea.hbm %s548_s7, 128  ;;  %p554_p0 = scmp.lt.s32.totalorder %s548_s7, %s795_s3 }
  0x1c   : > { %272 = vmatpush.msra.mxu0 %v187_v7  ;;  %482 = vmatpush.msra.mxu2 %v187_v7  ;;  %p550_p11 = scmp.ne.s32.totalorder %s548_s7, %s549_s8  ;;  %p555_p1 = scmp.lt.s32.totalorder %s553_s11, %s549_s8 }
  0x1d   : > { %313 = vmatpush.msra.mxu1 %v188_v8  ;;  %486 = vmatpush.msra.mxu3 %v188_v8 }
  0x1e   : > { %273 = vmatpush.msra.mxu0 %v185_v9  ;;  %483 = vmatpush.msra.mxu2 %v185_v9  ;;  %p551_p12 = pnand %p550_p11, %p658_p5  ;;  %p556_p2 = por %p555_p1, %p554_p0 }
  0x1f   : > { %314 = vmatpush.msra.mxu1 %v186_v10  ;;  %487 = vmatpush.msra.mxu3 %v186_v10 }
  0x20   : > { %457 = vmatmul.msk.f32.vlgmr.msra.gmra.mxu0 %vm233_vm0, %v169_v11  ;;  %461 = vmatmul.msk.f32.vlgmr.msra.gmra.mxu2 %vm233_vm0, %v173_v12  ;;  %p552_p13 = pneg %p551_p12 }
  0x21   : > { %465 = vmatmul.msk.f32.vlgmr.msra.gmra.mxu1 %vm233_vm0, %v169_v11  ;;  %469 = vmatmul.msk.f32.vlgmr.msra.gmra.mxu3 %vm233_vm0, %v173_v12 }
  0x22   : > { %210 = vperm.xlu1 %531, %v180_v13   ;;  %200 = vperm.xlu0 %530, %v178_v14   ;;  %p557_p3 = pnand %p556_p2, %p552_p13 }
  0x23   : > { %220 = vperm.xlu2 %532, %v182_v20  }
  0x28   : > { %458 = vmatmul.msk.f32.gmra.mxu0 %vm233_vm0, %v170_v16  ;;  %462 = vmatmul.msk.f32.gmra.mxu2 %vm233_vm0, %v174_v17 }
  0x29   : > { %466 = vmatmul.msk.f32.gmra.mxu1 %vm233_vm0, %v170_v16  ;;  %470 = vmatmul.msk.f32.gmra.mxu3 %vm233_vm0, %v174_v17 }
  0x2a   : > { %230 = vperm.xlu1 %531, %v184_v18   ;;  %225 = vperm.xlu0 %530, %v183_v19  }
  0x30   : > { %459 = vmatmul.msk.f32.gmra.mxu0 %vm233_vm0, %v171_v21  ;;  %463 = vmatmul.msk.f32.gmra.mxu2 %vm233_vm0, %v175_v22 }
  0x31   : > { %467 = vmatmul.msk.f32.gmra.mxu1 %vm233_vm0, %v171_v21  ;;  %471 = vmatmul.msk.f32.gmra.mxu3 %vm233_vm0, %v175_v22 }
  0x38   : > { %460 = vmatmul.msk.f32.gmra.mxu0 %vm233_vm0, %v172_v23  ;;  %464 = vmatmul.msk.f32.gmra.mxu2 %vm233_vm0, %v176_v24 }
  0x39   : > { %468 = vmatmul.msk.f32.gmra.mxu1 %vm233_vm0, %v172_v23  ;;  %472 = vmatmul.msk.f32.gmra.mxu3 %vm233_vm0, %v176_v24 }
  0x71   : > { %v216_v30 = vpop.permute.xlu2 %215 }
  0x7d   : > { %v221_v47 = vpop.permute.xlu2 %220 }
  0x87   : > { %v196_v25 = vpop.permute.xlu0 %195  ;;  %v206_v42 = vpop.permute.xlu1 %205 }
  0x94   : > { %v201_v36 = vpop.permute.xlu0 %200  ;;  %v211_v59 = vpop.permute.xlu1 %210 }
  0x9c   : > { %v226_v61 = vpop.permute.xlu0 %225  ;;  %v231_v10 = vpop.permute.xlu1 %230 }
  0x9d   : > { %v275_v26 = vpop.f32.mrf.mxu0 }
  0x9e   : > { %v276_v27 = vadd.f32 %v275_v26, %v196_v25  ;;  %v316_v28 = vpop.f32.mrf.mxu1 }
  0x9f   : > { %v317_v29 = vadd.f32 %v316_v28, %v196_v25 }
  0xa0   : > { %v340_v31 = vmax.f32 %v276_v27, 0.0 }
  0xa1   : > { %v341_v32 = vmax.f32 %v317_v29, 0.0 }
  0xa2   : > { %356 = vst [vmem:[%s740_s27] sm:$0xff] %v340_v31 }
  0xa3   : > { %357 = vst [vmem:[%s740_s27 + $0x8] sm:$0xff] %v341_v32  ;;  %v287_v33 = vpop.f32.mrf.mxu2 }
  0xa4   : > { %v288_v34 = vadd.f32 %v287_v33, %v216_v30  ;;  %v328_v35 = vpop.f32.mrf.mxu3 }
  0xa5   : > { %v329_v37 = vadd.f32 %v328_v35, %v216_v30  ;;  %v278_v38 = vpop.f32.mrf.mxu0 }
  0xa6   : > { %v348_v39 = vmax.f32 %v288_v34, 0.0  ;;  %v279_v40 = vadd.f32 %v278_v38, %v201_v36  ;;  %v319_v41 = vpop.f32.mrf.mxu1 }
  0xa7   : > { %v349_v43 = vmax.f32 %v329_v37, 0.0  ;;  %v320_v44 = vadd.f32 %v319_v41, %v201_v36 }
  0xa8   : > { %364 = vst [vmem:[%s740_s27 + $0x40] sm:$0xff] %v348_v39  ;;  %v342_v45 = vmax.f32 %v279_v40, 0.0 }
  0xa9   : > { %365 = vst [vmem:[%s740_s27 + $0x48] sm:$0xff] %v349_v43  ;;  %v343_v46 = vmax.f32 %v320_v44, 0.0 }
  0xaa   : > { %358 = vst [vmem:[%s740_s27 + $0x10] sm:$0xff] %v342_v45 }
  0xab   : > { %359 = vst [vmem:[%s740_s27 + $0x18] sm:$0xff] %v343_v46  ;;  %v290_v48 = vpop.f32.mrf.mxu2 }
  0xac   : > { %v291_v49 = vadd.f32 %v290_v48, %v221_v47  ;;  %v331_v50 = vpop.f32.mrf.mxu3 }
  0xad   : > { %v332_v51 = vadd.f32 %v331_v50, %v221_v47  ;;  %v281_v52 = vpop.f32.mrf.mxu0 }
  0xae   : > { %v350_v53 = vmax.f32 %v291_v49, 0.0  ;;  %v282_v54 = vadd.f32 %v281_v52, %v206_v42  ;;  %v322_v55 = vpop.f32.mrf.mxu1 }
  0xaf   : > { %v351_v56 = vmax.f32 %v332_v51, 0.0  ;;  %v323_v57 = vadd.f32 %v322_v55, %v206_v42 }
  0xb0   : > { %366 = vst [vmem:[%s740_s27 + $0x50] sm:$0xff] %v350_v53  ;;  %v344_v58 = vmax.f32 %v282_v54, 0.0 }
  0xb1   : > { %367 = vst [vmem:[%s740_s27 + $0x58] sm:$0xff] %v351_v56  ;;  %v345_v60 = vmax.f32 %v323_v57, 0.0 }
  0xb2   : > { %360 = vst [vmem:[%s740_s27 + $0x20] sm:$0xff] %v344_v58 }
  0xb3   : > { %361 = vst [vmem:[%s740_s27 + $0x28] sm:$0xff] %v345_v60  ;;  %v293_v62 = vpop.f32.mrf.mxu2 }
  0xb4   : > { %v294_v63 = vadd.f32 %v293_v62, %v226_v61  ;;  %v334_v0 = vpop.f32.mrf.mxu3 }
  0xb5   : > { %v335_v1 = vadd.f32 %v334_v0, %v226_v61  ;;  %v284_v2 = vpop.f32.mrf.mxu0 }
  0xb6   : > { %v352_v3 = vmax.f32 %v294_v63, 0.0  ;;  %v285_v4 = vadd.f32 %v284_v2, %v211_v59  ;;  %v325_v5 = vpop.f32.mrf.mxu1 }
  0xb7   : > { %v353_v6 = vmax.f32 %v335_v1, 0.0  ;;  %v326_v7 = vadd.f32 %v325_v5, %v211_v59 }
  0xb8   : > { %368 = vst [vmem:[%s740_s27 + $0x60] sm:$0xff] %v352_v3  ;;  %v346_v8 = vmax.f32 %v285_v4, 0.0 }
  0xb9   : > { %369 = vst [vmem:[%s740_s27 + $0x68] sm:$0xff] %v353_v6  ;;  %v347_v9 = vmax.f32 %v326_v7, 0.0 }
  0xba   : > { %362 = vst [vmem:[%s740_s27 + $0x30] sm:$0xff] %v346_v8 }
  0xbb   : > { %363 = vst [vmem:[%s740_s27 + $0x38] sm:$0xff] %v347_v9  ;;  %v296_v11 = vpop.f32.mrf.mxu2 }
  0xbc   : > { %v297_v12 = vadd.f32 %v296_v11, %v231_v10  ;;  %v337_v13 = vpop.f32.mrf.mxu3 }
  0xbd   : > { %v338_v14 = vadd.f32 %v337_v13, %v231_v10 }
  0xbe   : > { %v354_v15 = vmax.f32 %v297_v12, 0.0 }
  0xbf   : > { %v355_v16 = vmax.f32 %v338_v14, 0.0 }
  0xc0   : > { %370 = vst [vmem:[%s740_s27 + $0x70] sm:$0xff] %v354_v15 }
  0xc1   : > { %371 = vst [vmem:[%s740_s27 + $0x78] sm:$0xff] %v355_v16 }
  0xc2   : > { %560 = shalt.err (!%p557_p3)
}
  0xc3   : > { %s598_s20 = smov 256   ;;  %s599_s24 = smov 16  }
  0xc4   : > { %488 = dma.vmem_to_hbm [thread:$0]  (%p658_p5), %s386_s16, 2048, %s388_s5, %s373_s6, %s598_s20, %s598_s20, %s599_s24  }
  0xc5 PF: > { %p494_p4 = scmp.ge.s32.totalorder %s595_s15, 2  ;;  %s402_s25 = sand.u32 1, %s583_s12  }
  0xc6   : > { %s403_s26 = scalar_lea.sflag [#allocation3], %s402_s25 }
  0xc7   : > { %p491_p7 = pnand %p494_p4, %p662_p6 }
  0xc9   : > { %p492_p8 = pneg %p491_p7 }
  0xcb   : > { %578 = dma.done.wait (%p492_p8), %s403_s26, 2048  }
  0xcc   : > { %580 = vsyncadd (%p492_p8), %s403_s26, 4294965248  ;;  %p13_p9 = scmp.ge.s32.totalorder %s645_s18, 4   ;;  %s798_s12 = smov %s587_s13 }
  0xcd   : > { %s799_s13 = smov %s591_s14  ;;  %s800_s14 = smov %s656_s21 }
  0xce   : > { %s801_s15 = smov %s645_s18  ;;  %15 = sbr.rel (!%p13_p9) target bundleno = 3 (0x3), region = 67 }
  0xd3   :  { %409 = vsyncpa [#allocation3], 1 }
  0xd4   :  { %411 = vsyncpa [#allocation3 + $0x1], 1 }

</bundles_post_ra>
